<compile_context>
chip_gen: v7x
topology: tpu7x:2x2x1
jax: 0.10.0
libtpu: 0.0.40
codegen_flags: <defaults>
</compile_context>

<pallas_src>
import functools
import math

import numpy as np
import jax
import jax.numpy as jnp
from jax.experimental import pallas as pl
from jax.experimental.pallas import tpu as pltpu


# ---------------------------------------------------------------------------
# VMEM sizing helpers (generation aware: 128 MiB on v5e/v6e, 64 MiB on v7x)
# ---------------------------------------------------------------------------

def _vmem_capacity_bytes():
    try:
        return int(pltpu.get_tpu_info().vmem_capacity_bytes)
    except Exception:
        return 64 * 1024 * 1024            # conservative (v7x-sized) fallback


@functools.lru_cache(maxsize=None)
def _vmem_limit_bytes():
    # ~60% of physical VMEM: ~76 MiB on v5e/v6e, ~38 MiB on v7x.
    return max(32 * 1024 * 1024,
               min(int(0.6 * _vmem_capacity_bytes()), 100 * 1024 * 1024))


def _choose_hw_tile(hw_pad, bytes_per_col, fixed_bytes, budget, max_tile):
    """Largest lane-aligned tile (multiple of 128) dividing hw_pad within budget."""
    max_tile = max(int(max_tile), 128)
    for cand in (2048, 1024, 512, 256, 128):
        if cand > max_tile or hw_pad % cand:
            continue
        if fixed_bytes + cand * bytes_per_col <= budget:
            return cand
    return 128


def _choose_row_tile(ho, bytes_per_row, budget, max_rows=None):
    """Largest divisor of ho that is a multiple of 8 (or ho itself) within budget."""
    valid = sorted(d for d in range(1, ho + 1)
                   if ho % d == 0 and (d % 8 == 0 or d == ho))
    cap = budget // max(int(bytes_per_row), 1)
    if max_rows is not None:
        cap = min(cap, max_rows)
    fitting = [d for d in valid if d <= cap]
    return fitting[-1] if fitting else valid[0]


# ---------------------------------------------------------------------------
# Fused per-pixel DAG kernel (stage ops + full merge DAG + final logits)
# ---------------------------------------------------------------------------

def _make_fused_kernel(n_stages, wiring):
    """Fused kernel closed over the static DAG wiring.

    Per grid step (b, t) it sees, for each stage s:
        x_ref : (1, C_s, T)        feature tile, HW on lanes (f32 or bf16)
        w_ref : (1, hidden, C_s)   attention-folded per-batch 1x1 conv weight
        b_ref : (hidden, 1)        bias (f32)
    then the stacked merge weights:
        wm_ref : (NM, hidden, hidden), bm_ref : (NM, hidden, 1)
        wf_ref : (K, hidden) [1/T folded], bf_ref : (K, 1) [1/T folded]
    and writes o_ref : (1, K, T) f32 logits.
    """
    h0s0, h0s1, h1s0, h1s1 = wiring

    def kernel(*refs):
        o_ref = refs[-1]
        stage_refs = refs[:3 * n_stages]
        wm_ref, bm_ref, wf_ref, bf_ref = refs[3 * n_stages:3 * n_stages + 4]

        # ---- stage ops: (attention-folded) 1x1 conv + bias + ReLU ----------
        stage_out = []
        for s in range(n_stages):
            x_ref, w_ref, b_ref = stage_refs[3 * s:3 * s + 3]
            y = jnp.dot(w_ref[0], x_ref[0],
                        preferred_element_type=jnp.float32) + b_ref[...]
            stage_out.append(jnp.maximum(y, 0.0))                 # (hidden, T)

        # ---- merge DAG (all intermediates stay in VMEM/vregs) --------------
        counter = [0]

        def merge(a, b):
            k = counter[0]
            counter[0] += 1
            out = jnp.dot(wm_ref[k], a + b,
                          preferred_element_type=jnp.float32) + bm_ref[k]
            return jnp.maximum(out, 0.0)

        d00 = [merge(stage_out[i0], stage_out[i1]) for (i0, i1) in h0s0]
        d01 = [merge(d00[i0], d00[i1]) for (i0, i1) in h0s1]
        d10 = [merge(stage_out[i0], stage_out[i1]) for (i0, i1) in h1s0]
        d11 = [merge(d10[i0], d10[i1]) for (i0, i1) in h1s1]
        head_0 = merge(d01[0], d01[1])
        head_1 = merge(d11[0], d11[1])

        # ---- final head_merge (no ReLU); 1/T already folded into wf/bf -----
        o_ref[0] = jnp.dot(wf_ref[...], head_0 + head_1,
                           preferred_element_type=jnp.float32) + bf_ref[...]

    return kernel


def fused_dag_forward(stage_feats, stage_ws, stage_bops, wm, bm, wf, bf, *,
                      wiring, hw_tile, num_classes, vmem_limit):
    B = stage_feats[0].shape[0]
    HW = stage_feats[0].shape[2]
    n_tiles = HW // hw_tile
    n_stages = len(stage_feats)
    kernel = _make_fused_kernel(n_stages, wiring)

    in_specs, operands = [], []
    for s in range(n_stages):
        C = stage_feats[s].shape[1]
        hidden = stage_ws[s].shape[1]
        in_specs += [
            pl.BlockSpec((1, C, hw_tile), lambda b, t: (b, 0, t)),
            pl.BlockSpec((1, hidden, C), lambda b, t: (b, 0, 0)),
            pl.BlockSpec(stage_bops[s].shape, lambda b, t: (0, 0)),
        ]
        operands += [stage_feats[s], stage_ws[s], stage_bops[s]]
    in_specs += [
        pl.BlockSpec(wm.shape, lambda b, t: (0, 0, 0)),
        pl.BlockSpec(bm.shape, lambda b, t: (0, 0, 0)),
        pl.BlockSpec(wf.shape, lambda b, t: (0, 0)),
        pl.BlockSpec(bf.shape, lambda b, t: (0, 0)),
    ]
    operands += [wm, bm, wf, bf]

    return pl.pallas_call(
        kernel,
        out_shape=jax.ShapeDtypeStruct((B, num_classes, HW), jnp.float32),
        grid=(B, n_tiles),
        in_specs=in_specs,
        out_specs=pl.BlockSpec((1, num_classes, hw_tile), lambda b, t: (b, 0, t)),
        compiler_params=pltpu.CompilerParams(
            dimension_semantics=("parallel", "parallel"),
            vmem_limit_bytes=vmem_limit),
    )(*operands)


# ---------------------------------------------------------------------------
# Bilinear upsample kernel: out = Wr @ (x @ Wc^T), column pass shared per batch
# ---------------------------------------------------------------------------

def _interp_kernel(x_ref, wr_ref, wct_ref, o_ref, tmp_ref, *, num_classes, h):
    # Column interpolation for ALL classes as one (K*h, w) @ (w, Wo) matmul,
    # computed once per batch (row-tile axis is the inner, sequential axis).
    @pl.when(pl.program_id(1) == 0)
    def _():
        tmp_ref[...] = jnp.dot(x_ref[0].astype(jnp.float32), wct_ref[...],
                               preferred_element_type=jnp.float32)
    # Row interpolation per class against the row-tile of Wr (static unroll).
    for k in range(num_classes):
        o_ref[0, k] = jnp.dot(wr_ref[...], tmp_ref[pl.ds(k * h, h), :],
                              preferred_element_type=jnp.float32)


def bilinear_forward(x, wr, wct, *, max_rows_per_tile=None):
    """x: (B, K, h, w) -> (B, K, Ho, Wo) bilinear (align_corners=False)."""
    B, K, h, w = x.shape
    Ho = wr.shape[0]
    Wo = wct.shape[1]
    vmem_limit = _vmem_limit_bytes()
    fixed = 2 * K * h * w * 4 + K * h * Wo * 4 + 2 * w * Wo * 4
    bytes_per_row = 2 * K * Wo * 4 + 2 * h * 4
    budget = max(vmem_limit // 2 - fixed, 8 * bytes_per_row)
    ho_tile = _choose_row_tile(Ho, bytes_per_row, budget, max_rows_per_tile)

    x2 = x.reshape(B, K * h, w)            # host-side view; no in-kernel reshape
    kern = functools.partial(_interp_kernel, num_classes=K, h=h)
    return pl.pallas_call(
        kern,
        out_shape=jax.ShapeDtypeStruct((B, K, Ho, Wo), jnp.float32),
        grid=(B, Ho // ho_tile),
        in_specs=[
            pl.BlockSpec((1, K * h, w), lambda b, r: (b, 0, 0)),
            pl.BlockSpec((ho_tile, h), lambda b, r: (r, 0)),
            pl.BlockSpec((w, Wo), lambda b, r: (0, 0)),
        ],
        out_specs=pl.BlockSpec((1, K, ho_tile, Wo), lambda b, r: (b, 0, r, 0)),
        scratch_shapes=[pltpu.VMEM((K * h, Wo), jnp.float32)],
        compiler_params=pltpu.CompilerParams(
            dimension_semantics=("parallel", "arbitrary"),
            vmem_limit_bytes=vmem_limit),
    )(x2, wr, wct)


def _bilinear_matrix_np(n_in, scale):
    """PyTorch F.interpolate(mode='bilinear', align_corners=False) as a matrix."""
    n_out = int(n_in * scale)
    m = np.zeros((n_out, n_in), np.float32)
    for o in range(n_out):
        src = (o + 0.5) / float(scale) - 0.5
        src = min(max(src, 0.0), float(n_in - 1))
        lo = int(math.floor(src))
        hi = min(lo + 1, n_in - 1)
        w_hi = src - lo
        m[o, lo] += 1.0 - w_hi
        m[o, hi] += w_hi
    return m


# ---------------------------------------------------------------------------
# Model: parameter construction + graph wiring (mirrors Seg101Model)
# ---------------------------------------------------------------------------

class Seg101Pallas:
    def __init__(self, key, stages, stage_channels, hidden, num_classes,
                 head_0_stage_0_idxs, head_0_stage_1_idxs,
                 head_1_stage_0_idxs, head_1_stage_1_idxs,
                 max_hw_tile=1024, max_interp_rows=None,
                 feature_dtype=jnp.float32):
        self.stages = tuple(stages)
        self.hidden = hidden
        self.num_classes = num_classes
        self.h0s0 = tuple(head_0_stage_0_idxs)
        self.h0s1 = tuple(head_0_stage_1_idxs)
        self.h1s0 = tuple(head_1_stage_0_idxs)
        self.h1s1 = tuple(head_1_stage_1_idxs)
        self.max_hw_tile = max_hw_tile
        self.max_interp_rows = max_interp_rows
        self.feature_dtype = feature_dtype
        self._interp_cache = {}

        keys = iter(jax.random.split(key, 128))

        # ResNet-style init (Seg101Model._init_weights):
        #   Conv2d 1x1: normal(0, sqrt(2 / (kH*kW*out_ch))), bias zero
        #   Linear    : normal(0, 0.01), bias zero
        params = {}
        for s in self.stages:
            C = stage_channels[s]
            wg = 0.01 * jax.random.normal(next(keys), (C, C), jnp.float32)   # (out,in)
            wop = math.sqrt(2.0 / hidden) * jax.random.normal(
                next(keys), (hidden, C), jnp.float32)                        # (Cout,Cin)
            params[s] = dict(
                wg_t=jnp.transpose(wg),                 # (Cin, Cout) for pooled @ wg_t
                bg=jnp.zeros((C,), jnp.float32),
                wop=wop,
                bop=jnp.zeros((hidden, 1), jnp.float32))
        self.params = params

        # Stacked hidden->hidden merge weights, ordering MUST match the kernel:
        #   h0s0..., h0s1..., h1s0..., h1s1..., head_merge_0, head_merge_1
        n_merges = (len(self.h0s0) + len(self.h0s1) +
                    len(self.h1s0) + len(self.h1s1) + 2)
        wm = [math.sqrt(2.0 / hidden) * jax.random.normal(
                  next(keys), (hidden, hidden), jnp.float32)
              for _ in range(n_merges)]
        self.wm = jnp.stack(wm, axis=0)                                   # (NM, hid, hid)
        self.bm = jnp.zeros((n_merges, hidden, 1), jnp.float32)
        self.wf = math.sqrt(2.0 / num_classes) * jax.random.normal(
            next(keys), (num_classes, hidden), jnp.float32)               # (K, hid)
        self.bf = jnp.zeros((num_classes, 1), jnp.float32)

    # -- mirrors Seg101Model.layers (plus the /T that forward applies) ------
    def layers(self, features, T=1.0, feature_dtype=None):
        fdt = self.feature_dtype if feature_dtype is None else feature_dtype
        stage_feats, stage_ws, stage_bops = [], [], []
        H = W = None
        sum_C = 0
        for s in self.stages:
            v = features[s]
            # tuple path: attention source = v[0], features = v[1]
            x_att, x_feat = (v[0], v[1]) if isinstance(v, tuple) else (v, v)
            B, C, h, w = x_feat.shape
            if H is None:
                H, W = h, w
            # NOTE: all stage features must share (H, W); resize before calling.
            assert (h, w) == (H, W), "all stage features must share H, W"
            sum_C += C
            p = self.params[s]
            # channel attention (tiny full-HW reduction + (B,C)@(C,C)): plain XLA
            pooled = jnp.mean(x_att.reshape(B, x_att.shape[1], -1), axis=2)  # (B,C)
            att = jax.nn.sigmoid(pooled @ p["wg_t"] + p["bg"])               # (B,C)
            # fold attention into the per-batch stage conv weight (review #1)
            stage_ws.append((p["wop"][None] * att[:, None, :]).astype(fdt))  # (B,hid,C)
            stage_feats.append(x_feat.reshape(B, C, h * w).astype(fdt))      # (B,C,HW)
            stage_bops.append(p["bop"])

        # pad flattened HW up to a lane multiple (128) -> lane-dense stores
        HW = H * W
        HW_pad = ((HW + 127) // 128) * 128
        if HW_pad != HW:
            stage_feats = [jnp.pad(f, ((0, 0), (0, 0), (0, HW_pad - HW)))
                           for f in stage_feats]

        # fold 1/T into the final head_merge weights (review #2)
        inv_T = 1.0 / float(T)
        wf = self.wf * inv_T
        bf = self.bf * inv_T

        # VMEM-aware tile choice (v7x = 64 MiB, v5e/v6e = 128 MiB)
        feat_bytes = jnp.dtype(fdt).itemsize
        n_merges = self.wm.shape[0]
        live = len(self.stages) + len(self.h0s0) + len(self.h1s0) + 2  # live DAG tensors
        bytes_per_col = (2 * (sum_C * feat_bytes + self.num_classes * 4)
                         + live * self.hidden * 4)
        fixed = (2 * sum(self.hidden * self.params[s]["wop"].shape[1] * feat_bytes
                         + self.hidden * 4 for s in self.stages)
                 + 2 * (n_merges * self.hidden * self.hidden * 4
                        + n_merges * self.hidden * 4
                        + self.num_classes * self.hidden * 4
                        + self.num_classes * 4))
        vmem_limit = _vmem_limit_bytes()
        hw_tile = _choose_hw_tile(HW_pad, bytes_per_col, fixed,
                                  vmem_limit // 2, self.max_hw_tile)

        out = fused_dag_forward(
            stage_feats, stage_ws, stage_bops, self.wm, self.bm, wf, bf,
            wiring=(self.h0s0, self.h0s1, self.h1s0, self.h1s1),
            hw_tile=hw_tile, num_classes=self.num_classes,
            vmem_limit=vmem_limit)                                    # (B,K,HW_pad)
        out = out[:, :, :HW]
        return out.reshape(out.shape[0], self.num_classes, H, W)

    def _interp_matrices(self, h, w, sh, sw):
        key = (h, w, sh, sw)
        if key not in self._interp_cache:
            wr = jnp.asarray(_bilinear_matrix_np(h, sh))                  # (Ho, h)
            wct = jnp.asarray(_bilinear_matrix_np(w, sw).T)               # (w, Wo)
            self._interp_cache[key] = (wr, wct)
        return self._interp_cache[key]

    # -- mirrors Seg101Model.forward (eval / inference path) ----------------
    def forward(self, features, targets, T=1.0, zero_costs=False,
                feature_dtype=None):
        out = self.layers(features, T, feature_dtype=feature_dtype)
        _, _, h, w = out.shape
        Ht, Wt = targets.shape[1], targets.shape[2]
        assert Ht % h == 0 and Wt % w == 0, (
            "target resolution must be an integer multiple of logit resolution")
        sh, sw = Ht // h, Wt // w
        if zero_costs:
            return out
        wr, wct = self._interp_matrices(h, w, sh, sw)
        y = bilinear_forward(out, wr, wct,
                             max_rows_per_tile=self.max_interp_rows)
        # TODO(synk): training loss path (CrossEntropy / DeepLabCE / dice) not implemented.
        return y, {}


# ---------------------------------------------------------------------------
# Pure-JAX reference (same math, f32) for a sanity check
# ---------------------------------------------------------------------------

def reference_forward(model, features, targets, T=1.0):
    stage_out = []
    H = W = None
    for s in model.stages:
        v = features[s]
        x_att, x_feat = (v[0], v[1]) if isinstance(v, tuple) else (v, v)
        B, C, H, W = x_feat.shape
        p = model.params[s]
        pooled = jnp.mean(x_att.reshape(B, x_att.shape[1], -1), axis=2)
        att = jax.nn.sigmoid(pooled @ p["wg_t"] + p["bg"])
        xf = x_feat.reshape(B, C, H * W) * att[:, :, None]
        y = jnp.einsum("oc,bct->bot", p["wop"], xf) + p["bop"][None]
        stage_out.append(jnp.maximum(y, 0.0))

    k_iter = iter(range(model.wm.shape[0]))

    def merge(a, b):
        k = next(k_iter)
        out = jnp.einsum("oc,bct->bot", model.wm[k], a + b) + model.bm[k][None]
        return jnp.maximum(out, 0.0)

    d00 = [merge(stage_out[i0], stage_out[i1]) for (i0, i1) in model.h0s0]
    d01 = [merge(d00[i0], d00[i1]) for (i0, i1) in model.h0s1]
    d10 = [merge(stage_out[i0], stage_out[i1]) for (i0, i1) in model.h1s0]
    d11 = [merge(d10[i0], d10[i1]) for (i0, i1) in model.h1s1]
    head_0 = merge(d01[0], d01[1])
    head_1 = merge(d11[0], d11[1])
    logits = (jnp.einsum("oc,bct->bot", model.wf, head_0 + head_1)
              + model.bf[None]) / T
    B = logits.shape[0]
    out = logits.reshape(B, model.num_classes, H, W)
    sh, sw = targets.shape[1] // H, targets.shape[2] // W
    wr = jnp.asarray(_bilinear_matrix_np(H, sh))
    wc = jnp.asarray(_bilinear_matrix_np(W, sw))
    return jnp.einsum("Hh,bkhw,Ww->bkHW", wr, out, wc)


# ---------------------------------------------------------------------------

if __name__ == "__main__":
    key = jax.random.PRNGKey(0)
    k_model, k_f0, k_f1, k_t, k_g0, k_g1, k_t2 = jax.random.split(key, 7)

    B, H, W = 2, 16, 16
    stage_channels = {"s0": 8, "s1": 16}
    hidden, num_classes = 16, 8

    model = Seg101Pallas(
        k_model,
        stages=("s0", "s1"),
        stage_channels=stage_channels,
        hidden=hidden,
        num_classes=num_classes,
        head_0_stage_0_idxs=[(0, 1), (1, 0)],
        head_0_stage_1_idxs=[(0, 1), (1, 0)],
        head_1_stage_0_idxs=[(0, 1), (0, 0)],
        head_1_stage_1_idxs=[(0, 1), (1, 1)],
        max_hw_tile=128,      # force >1 HW tile at this small size
        max_interp_rows=16,   # force >1 output row tile in the bilinear kernel
    )

    features = {
        "s0": jax.random.normal(k_f0, (B, stage_channels["s0"], H, W), jnp.float32),
        "s1": jax.random.normal(k_f1, (B, stage_channels["s1"], H, W), jnp.float32),
    }
    # targets at 2x resolution -> common_stride = (2, 2)
    targets = jax.random.randint(k_t, (B, 2 * H, 2 * W), 0, num_classes)

    # --- path 1: f32 features, HW multiple of 128 ---------------------------
    y, aux = model.forward(features, targets, T=1.0)
    y = jax.block_until_ready(y)
    y_ref = jax.block_until_ready(reference_forward(model, features, targets, T=1.0))
    assert y.shape == (B, num_classes, 2 * H, 2 * W), y.shape
    max_err = float(jnp.max(jnp.abs(y - y_ref)))
    assert jnp.allclose(y, y_ref, atol=1e-2, rtol=1e-2), max_err

    # --- path 2: bf16 features + non-128-multiple HW (exercises lane padding)
    H2 = W2 = 12
    features2 = {
        "s0": jax.random.normal(k_g0, (B, stage_channels["s0"], H2, W2), jnp.float32),
        "s1": jax.random.normal(k_g1, (B, stage_channels["s1"], H2, W2), jnp.float32),
    }
    targets2 = jax.random.randint(k_t2, (B, 2 * H2, 2 * W2), 0, num_classes)
    y2, _ = model.forward(features2, targets2, T=1.0, feature_dtype=jnp.bfloat16)
    y2 = jax.block_until_ready(y2)
    y2_ref = jax.block_until_ready(
        reference_forward(model, features2, targets2, T=1.0))
    assert y2.shape == (B, num_classes, 2 * H2, 2 * W2), y2.shape
    max_err2 = float(jnp.max(jnp.abs(y2 - y2_ref)))
    assert jnp.allclose(y2, y2_ref, atol=1e-1, rtol=1e-1), max_err2

    print("KERNEL_OK")
</pallas_src>

<mosaic_0001>
module attributes {stable_mosaic.version = 11 : i64} {
  func.func @kernel(%arg0: i32, %arg1: i32, %arg2: memref<1x8x128xf32, #tpu.memory_space<vmem>>, %arg3: memref<1x16x8xf32, #tpu.memory_space<vmem>>, %arg4: memref<16x1xf32, #tpu.memory_space<vmem>>, %arg5: memref<1x16x128xf32, #tpu.memory_space<vmem>>, %arg6: memref<1x16x16xf32, #tpu.memory_space<vmem>>, %arg7: memref<16x1xf32, #tpu.memory_space<vmem>>, %arg8: memref<10x16x16xf32, #tpu.memory_space<vmem>>, %arg9: memref<10x16x1xf32, #tpu.memory_space<vmem>>, %arg10: memref<8x16xf32, #tpu.memory_space<vmem>>, %arg11: memref<8x1xf32, #tpu.memory_space<vmem>>, %arg12: memref<1x8x128xf32, #tpu.memory_space<vmem>>) attributes {dimension_semantics = [#tpu.dimension_semantics<parallel>, #tpu.dimension_semantics<parallel>], iteration_bounds = array<i64: 2, 2>, scalar_prefetch = 0 : i64, scratch_operands = 0 : i64, tpu.core_type = #tpu.core_type<tc>, window_params = [{transform_indices = @transform_0, window_bounds = array<i64: 1, 8, 128>}, {transform_indices = @transform_1, window_bounds = array<i64: 1, 16, 8>}, {pipeline_mode = #tpu.pipeline_mode<synchronous>, transform_indices = @transform_2, window_bounds = array<i64: 16, 1>}, {transform_indices = @transform_3, window_bounds = array<i64: 1, 16, 128>}, {transform_indices = @transform_4, window_bounds = array<i64: 1, 16, 16>}, {pipeline_mode = #tpu.pipeline_mode<synchronous>, transform_indices = @transform_5, window_bounds = array<i64: 16, 1>}, {pipeline_mode = #tpu.pipeline_mode<synchronous>, transform_indices = @transform_6, window_bounds = array<i64: 10, 16, 16>}, {pipeline_mode = #tpu.pipeline_mode<synchronous>, transform_indices = @transform_7, window_bounds = array<i64: 10, 16, 1>}, {pipeline_mode = #tpu.pipeline_mode<synchronous>, transform_indices = @transform_8, window_bounds = array<i64: 8, 16>}, {pipeline_mode = #tpu.pipeline_mode<synchronous>, transform_indices = @transform_9, window_bounds = array<i64: 8, 1>}, {transform_indices = @transform_10, window_bounds = array<i64: 1, 8, 128>}]} {
    %c0 = arith.constant 0 : index
    %c0_0 = arith.constant 0 : index
    %c0_1 = arith.constant 0 : index
    %0 = vector.load %arg3[%c0, %c0_0, %c0_1] : memref<1x16x8xf32, #tpu.memory_space<vmem>>, vector<1x16x8xf32>
    %1 = vector.shape_cast %0 : vector<1x16x8xf32> to vector<16x8xf32>
    %c0_2 = arith.constant 0 : index
    %c0_3 = arith.constant 0 : index
    %c0_4 = arith.constant 0 : index
    %2 = vector.load %arg2[%c0_2, %c0_3, %c0_4] : memref<1x8x128xf32, #tpu.memory_space<vmem>>, vector<1x8x128xf32>
    %3 = vector.shape_cast %2 : vector<1x8x128xf32> to vector<8x128xf32>
    %cst = arith.constant dense<0.000000e+00> : vector<16x128xf32>
    %4 = tpu.matmul %1, %3, %cst {dimension_numbers = #tpu.dot_dimension_numbers<[1], [0], [0], [1], [0, 0, 1, 1], [], []>} : vector<16x8xf32>, vector<8x128xf32>, vector<16x128xf32> -> vector<16x128xf32>
    %c0_5 = arith.constant 0 : index
    %c0_6 = arith.constant 0 : index
    %5 = vector.load %arg4[%c0_5, %c0_6] : memref<16x1xf32, #tpu.memory_space<vmem>>, vector<16x1xf32>
    %6 = vector.broadcast %5 : vector<16x1xf32> to vector<16x128xf32>
    %7 = arith.addf %4, %6 : vector<16x128xf32>
    %cst_7 = arith.constant 0.000000e+00 : f32
    %8 = vector.broadcast %cst_7 : f32 to vector<16x128xf32>
    %9 = arith.maximumf %7, %8 : vector<16x128xf32>
    %c0_8 = arith.constant 0 : index
    %c0_9 = arith.constant 0 : index
    %c0_10 = arith.constant 0 : index
    %10 = vector.load %arg6[%c0_8, %c0_9, %c0_10] : memref<1x16x16xf32, #tpu.memory_space<vmem>>, vector<1x16x16xf32>
    %11 = vector.shape_cast %10 : vector<1x16x16xf32> to vector<16x16xf32>
    %c0_11 = arith.constant 0 : index
    %c0_12 = arith.constant 0 : index
    %c0_13 = arith.constant 0 : index
    %12 = vector.load %arg5[%c0_11, %c0_12, %c0_13] : memref<1x16x128xf32, #tpu.memory_space<vmem>>, vector<1x16x128xf32>
    %13 = vector.shape_cast %12 : vector<1x16x128xf32> to vector<16x128xf32>
    %cst_14 = arith.constant dense<0.000000e+00> : vector<16x128xf32>
    %14 = tpu.matmul %11, %13, %cst_14 {dimension_numbers = #tpu.dot_dimension_numbers<[1], [0], [0], [1], [0, 0, 1, 1], [], []>} : vector<16x16xf32>, vector<16x128xf32>, vector<16x128xf32> -> vector<16x128xf32>
    %c0_15 = arith.constant 0 : index
    %c0_16 = arith.constant 0 : index
    %15 = vector.load %arg7[%c0_15, %c0_16] : memref<16x1xf32, #tpu.memory_space<vmem>>, vector<16x1xf32>
    %16 = vector.broadcast %15 : vector<16x1xf32> to vector<16x128xf32>
    %17 = arith.addf %14, %16 : vector<16x128xf32>
    %cst_17 = arith.constant 0.000000e+00 : f32
    %18 = vector.broadcast %cst_17 : f32 to vector<16x128xf32>
    %19 = arith.maximumf %17, %18 : vector<16x128xf32>
    %c0_18 = arith.constant 0 : index
    %c0_19 = arith.constant 0 : index
    %c0_20 = arith.constant 0 : index
    %20 = vector.load %arg8[%c0_18, %c0_19, %c0_20] : memref<10x16x16xf32, #tpu.memory_space<vmem>>, vector<1x16x16xf32>
    %21 = vector.shape_cast %20 : vector<1x16x16xf32> to vector<16x16xf32>
    %22 = arith.addf %9, %19 : vector<16x128xf32>
    %cst_21 = arith.constant dense<0.000000e+00> : vector<16x128xf32>
    %23 = tpu.matmul %21, %22, %cst_21 {dimension_numbers = #tpu.dot_dimension_numbers<[1], [0], [0], [1], [0, 0, 1, 1], [], []>} : vector<16x16xf32>, vector<16x128xf32>, vector<16x128xf32> -> vector<16x128xf32>
    %c0_22 = arith.constant 0 : index
    %c0_23 = arith.constant 0 : index
    %c0_24 = arith.constant 0 : index
    %24 = vector.load %arg9[%c0_22, %c0_23, %c0_24] : memref<10x16x1xf32, #tpu.memory_space<vmem>>, vector<1x16x1xf32>
    %25 = vector.shape_cast %24 : vector<1x16x1xf32> to vector<16x1xf32>
    %26 = vector.broadcast %25 : vector<16x1xf32> to vector<16x128xf32>
    %27 = arith.addf %23, %26 : vector<16x128xf32>
    %cst_25 = arith.constant 0.000000e+00 : f32
    %28 = vector.broadcast %cst_25 : f32 to vector<16x128xf32>
    %29 = arith.maximumf %27, %28 : vector<16x128xf32>
    %c1 = arith.constant 1 : index
    %c0_26 = arith.constant 0 : index
    %c0_27 = arith.constant 0 : index
    %30 = vector.load %arg8[%c1, %c0_26, %c0_27] : memref<10x16x16xf32, #tpu.memory_space<vmem>>, vector<1x16x16xf32>
    %31 = vector.shape_cast %30 : vector<1x16x16xf32> to vector<16x16xf32>
    %32 = arith.addf %19, %9 : vector<16x128xf32>
    %cst_28 = arith.constant dense<0.000000e+00> : vector<16x128xf32>
    %33 = tpu.matmul %31, %32, %cst_28 {dimension_numbers = #tpu.dot_dimension_numbers<[1], [0], [0], [1], [0, 0, 1, 1], [], []>} : vector<16x16xf32>, vector<16x128xf32>, vector<16x128xf32> -> vector<16x128xf32>
    %c1_29 = arith.constant 1 : index
    %c0_30 = arith.constant 0 : index
    %c0_31 = arith.constant 0 : index
    %34 = vector.load %arg9[%c1_29, %c0_30, %c0_31] : memref<10x16x1xf32, #tpu.memory_space<vmem>>, vector<1x16x1xf32>
    %35 = vector.shape_cast %34 : vector<1x16x1xf32> to vector<16x1xf32>
    %36 = vector.broadcast %35 : vector<16x1xf32> to vector<16x128xf32>
    %37 = arith.addf %33, %36 : vector<16x128xf32>
    %cst_32 = arith.constant 0.000000e+00 : f32
    %38 = vector.broadcast %cst_32 : f32 to vector<16x128xf32>
    %39 = arith.maximumf %37, %38 : vector<16x128xf32>
    %c2 = arith.constant 2 : index
    %c0_33 = arith.constant 0 : index
    %c0_34 = arith.constant 0 : index
    %40 = vector.load %arg8[%c2, %c0_33, %c0_34] : memref<10x16x16xf32, #tpu.memory_space<vmem>>, vector<1x16x16xf32>
    %41 = vector.shape_cast %40 : vector<1x16x16xf32> to vector<16x16xf32>
    %42 = arith.addf %29, %39 : vector<16x128xf32>
    %cst_35 = arith.constant dense<0.000000e+00> : vector<16x128xf32>
    %43 = tpu.matmul %41, %42, %cst_35 {dimension_numbers = #tpu.dot_dimension_numbers<[1], [0], [0], [1], [0, 0, 1, 1], [], []>} : vector<16x16xf32>, vector<16x128xf32>, vector<16x128xf32> -> vector<16x128xf32>
    %c2_36 = arith.constant 2 : index
    %c0_37 = arith.constant 0 : index
    %c0_38 = arith.constant 0 : index
    %44 = vector.load %arg9[%c2_36, %c0_37, %c0_38] : memref<10x16x1xf32, #tpu.memory_space<vmem>>, vector<1x16x1xf32>
    %45 = vector.shape_cast %44 : vector<1x16x1xf32> to vector<16x1xf32>
    %46 = vector.broadcast %45 : vector<16x1xf32> to vector<16x128xf32>
    %47 = arith.addf %43, %46 : vector<16x128xf32>
    %cst_39 = arith.constant 0.000000e+00 : f32
    %48 = vector.broadcast %cst_39 : f32 to vector<16x128xf32>
    %49 = arith.maximumf %47, %48 : vector<16x128xf32>
    %c3 = arith.constant 3 : index
    %c0_40 = arith.constant 0 : index
    %c0_41 = arith.constant 0 : index
    %50 = vector.load %arg8[%c3, %c0_40, %c0_41] : memref<10x16x16xf32, #tpu.memory_space<vmem>>, vector<1x16x16xf32>
    %51 = vector.shape_cast %50 : vector<1x16x16xf32> to vector<16x16xf32>
    %52 = arith.addf %39, %29 : vector<16x128xf32>
    %cst_42 = arith.constant dense<0.000000e+00> : vector<16x128xf32>
    %53 = tpu.matmul %51, %52, %cst_42 {dimension_numbers = #tpu.dot_dimension_numbers<[1], [0], [0], [1], [0, 0, 1, 1], [], []>} : vector<16x16xf32>, vector<16x128xf32>, vector<16x128xf32> -> vector<16x128xf32>
    %c3_43 = arith.constant 3 : index
    %c0_44 = arith.constant 0 : index
    %c0_45 = arith.constant 0 : index
    %54 = vector.load %arg9[%c3_43, %c0_44, %c0_45] : memref<10x16x1xf32, #tpu.memory_space<vmem>>, vector<1x16x1xf32>
    %55 = vector.shape_cast %54 : vector<1x16x1xf32> to vector<16x1xf32>
    %56 = vector.broadcast %55 : vector<16x1xf32> to vector<16x128xf32>
    %57 = arith.addf %53, %56 : vector<16x128xf32>
    %cst_46 = arith.constant 0.000000e+00 : f32
    %58 = vector.broadcast %cst_46 : f32 to vector<16x128xf32>
    %59 = arith.maximumf %57, %58 : vector<16x128xf32>
    %c4 = arith.constant 4 : index
    %c0_47 = arith.constant 0 : index
    %c0_48 = arith.constant 0 : index
    %60 = vector.load %arg8[%c4, %c0_47, %c0_48] : memref<10x16x16xf32, #tpu.memory_space<vmem>>, vector<1x16x16xf32>
    %61 = vector.shape_cast %60 : vector<1x16x16xf32> to vector<16x16xf32>
    %62 = arith.addf %9, %19 : vector<16x128xf32>
    %cst_49 = arith.constant dense<0.000000e+00> : vector<16x128xf32>
    %63 = tpu.matmul %61, %62, %cst_49 {dimension_numbers = #tpu.dot_dimension_numbers<[1], [0], [0], [1], [0, 0, 1, 1], [], []>} : vector<16x16xf32>, vector<16x128xf32>, vector<16x128xf32> -> vector<16x128xf32>
    %c4_50 = arith.constant 4 : index
    %c0_51 = arith.constant 0 : index
    %c0_52 = arith.constant 0 : index
    %64 = vector.load %arg9[%c4_50, %c0_51, %c0_52] : memref<10x16x1xf32, #tpu.memory_space<vmem>>, vector<1x16x1xf32>
    %65 = vector.shape_cast %64 : vector<1x16x1xf32> to vector<16x1xf32>
    %66 = vector.broadcast %65 : vector<16x1xf32> to vector<16x128xf32>
    %67 = arith.addf %63, %66 : vector<16x128xf32>
    %cst_53 = arith.constant 0.000000e+00 : f32
    %68 = vector.broadcast %cst_53 : f32 to vector<16x128xf32>
    %69 = arith.maximumf %67, %68 : vector<16x128xf32>
    %c5 = arith.constant 5 : index
    %c0_54 = arith.constant 0 : index
    %c0_55 = arith.constant 0 : index
    %70 = vector.load %arg8[%c5, %c0_54, %c0_55] : memref<10x16x16xf32, #tpu.memory_space<vmem>>, vector<1x16x16xf32>
    %71 = vector.shape_cast %70 : vector<1x16x16xf32> to vector<16x16xf32>
    %72 = arith.addf %9, %9 : vector<16x128xf32>
    %cst_56 = arith.constant dense<0.000000e+00> : vector<16x128xf32>
    %73 = tpu.matmul %71, %72, %cst_56 {dimension_numbers = #tpu.dot_dimension_numbers<[1], [0], [0], [1], [0, 0, 1, 1], [], []>} : vector<16x16xf32>, vector<16x128xf32>, vector<16x128xf32> -> vector<16x128xf32>
    %c5_57 = arith.constant 5 : index
    %c0_58 = arith.constant 0 : index
    %c0_59 = arith.constant 0 : index
    %74 = vector.load %arg9[%c5_57, %c0_58, %c0_59] : memref<10x16x1xf32, #tpu.memory_space<vmem>>, vector<1x16x1xf32>
    %75 = vector.shape_cast %74 : vector<1x16x1xf32> to vector<16x1xf32>
    %76 = vector.broadcast %75 : vector<16x1xf32> to vector<16x128xf32>
    %77 = arith.addf %73, %76 : vector<16x128xf32>
    %cst_60 = arith.constant 0.000000e+00 : f32
    %78 = vector.broadcast %cst_60 : f32 to vector<16x128xf32>
    %79 = arith.maximumf %77, %78 : vector<16x128xf32>
    %c6 = arith.constant 6 : index
    %c0_61 = arith.constant 0 : index
    %c0_62 = arith.constant 0 : index
    %80 = vector.load %arg8[%c6, %c0_61, %c0_62] : memref<10x16x16xf32, #tpu.memory_space<vmem>>, vector<1x16x16xf32>
    %81 = vector.shape_cast %80 : vector<1x16x16xf32> to vector<16x16xf32>
    %82 = arith.addf %69, %79 : vector<16x128xf32>
    %cst_63 = arith.constant dense<0.000000e+00> : vector<16x128xf32>
    %83 = tpu.matmul %81, %82, %cst_63 {dimension_numbers = #tpu.dot_dimension_numbers<[1], [0], [0], [1], [0, 0, 1, 1], [], []>} : vector<16x16xf32>, vector<16x128xf32>, vector<16x128xf32> -> vector<16x128xf32>
    %c6_64 = arith.constant 6 : index
    %c0_65 = arith.constant 0 : index
    %c0_66 = arith.constant 0 : index
    %84 = vector.load %arg9[%c6_64, %c0_65, %c0_66] : memref<10x16x1xf32, #tpu.memory_space<vmem>>, vector<1x16x1xf32>
    %85 = vector.shape_cast %84 : vector<1x16x1xf32> to vector<16x1xf32>
    %86 = vector.broadcast %85 : vector<16x1xf32> to vector<16x128xf32>
    %87 = arith.addf %83, %86 : vector<16x128xf32>
    %cst_67 = arith.constant 0.000000e+00 : f32
    %88 = vector.broadcast %cst_67 : f32 to vector<16x128xf32>
    %89 = arith.maximumf %87, %88 : vector<16x128xf32>
    %c7 = arith.constant 7 : index
    %c0_68 = arith.constant 0 : index
    %c0_69 = arith.constant 0 : index
    %90 = vector.load %arg8[%c7, %c0_68, %c0_69] : memref<10x16x16xf32, #tpu.memory_space<vmem>>, vector<1x16x16xf32>
    %91 = vector.shape_cast %90 : vector<1x16x16xf32> to vector<16x16xf32>
    %92 = arith.addf %79, %79 : vector<16x128xf32>
    %cst_70 = arith.constant dense<0.000000e+00> : vector<16x128xf32>
    %93 = tpu.matmul %91, %92, %cst_70 {dimension_numbers = #tpu.dot_dimension_numbers<[1], [0], [0], [1], [0, 0, 1, 1], [], []>} : vector<16x16xf32>, vector<16x128xf32>, vector<16x128xf32> -> vector<16x128xf32>
    %c7_71 = arith.constant 7 : index
    %c0_72 = arith.constant 0 : index
    %c0_73 = arith.constant 0 : index
    %94 = vector.load %arg9[%c7_71, %c0_72, %c0_73] : memref<10x16x1xf32, #tpu.memory_space<vmem>>, vector<1x16x1xf32>
    %95 = vector.shape_cast %94 : vector<1x16x1xf32> to vector<16x1xf32>
    %96 = vector.broadcast %95 : vector<16x1xf32> to vector<16x128xf32>
    %97 = arith.addf %93, %96 : vector<16x128xf32>
    %cst_74 = arith.constant 0.000000e+00 : f32
    %98 = vector.broadcast %cst_74 : f32 to vector<16x128xf32>
    %99 = arith.maximumf %97, %98 : vector<16x128xf32>
    %c8 = arith.constant 8 : index
    %c0_75 = arith.constant 0 : index
    %c0_76 = arith.constant 0 : index
    %100 = vector.load %arg8[%c8, %c0_75, %c0_76] : memref<10x16x16xf32, #tpu.memory_space<vmem>>, vector<1x16x16xf32>
    %101 = vector.shape_cast %100 : vector<1x16x16xf32> to vector<16x16xf32>
    %102 = arith.addf %49, %59 : vector<16x128xf32>
    %cst_77 = arith.constant dense<0.000000e+00> : vector<16x128xf32>
    %103 = tpu.matmul %101, %102, %cst_77 {dimension_numbers = #tpu.dot_dimension_numbers<[1], [0], [0], [1], [0, 0, 1, 1], [], []>} : vector<16x16xf32>, vector<16x128xf32>, vector<16x128xf32> -> vector<16x128xf32>
    %c8_78 = arith.constant 8 : index
    %c0_79 = arith.constant 0 : index
    %c0_80 = arith.constant 0 : index
    %104 = vector.load %arg9[%c8_78, %c0_79, %c0_80] : memref<10x16x1xf32, #tpu.memory_space<vmem>>, vector<1x16x1xf32>
    %105 = vector.shape_cast %104 : vector<1x16x1xf32> to vector<16x1xf32>
    %106 = vector.broadcast %105 : vector<16x1xf32> to vector<16x128xf32>
    %107 = arith.addf %103, %106 : vector<16x128xf32>
    %cst_81 = arith.constant 0.000000e+00 : f32
    %108 = vector.broadcast %cst_81 : f32 to vector<16x128xf32>
    %109 = arith.maximumf %107, %108 : vector<16x128xf32>
    %c9 = arith.constant 9 : index
    %c0_82 = arith.constant 0 : index
    %c0_83 = arith.constant 0 : index
    %110 = vector.load %arg8[%c9, %c0_82, %c0_83] : memref<10x16x16xf32, #tpu.memory_space<vmem>>, vector<1x16x16xf32>
    %111 = vector.shape_cast %110 : vector<1x16x16xf32> to vector<16x16xf32>
    %112 = arith.addf %89, %99 : vector<16x128xf32>
    %cst_84 = arith.constant dense<0.000000e+00> : vector<16x128xf32>
    %113 = tpu.matmul %111, %112, %cst_84 {dimension_numbers = #tpu.dot_dimension_numbers<[1], [0], [0], [1], [0, 0, 1, 1], [], []>} : vector<16x16xf32>, vector<16x128xf32>, vector<16x128xf32> -> vector<16x128xf32>
    %c9_85 = arith.constant 9 : index
    %c0_86 = arith.constant 0 : index
    %c0_87 = arith.constant 0 : index
    %114 = vector.load %arg9[%c9_85, %c0_86, %c0_87] : memref<10x16x1xf32, #tpu.memory_space<vmem>>, vector<1x16x1xf32>
    %115 = vector.shape_cast %114 : vector<1x16x1xf32> to vector<16x1xf32>
    %116 = vector.broadcast %115 : vector<16x1xf32> to vector<16x128xf32>
    %117 = arith.addf %113, %116 : vector<16x128xf32>
    %cst_88 = arith.constant 0.000000e+00 : f32
    %118 = vector.broadcast %cst_88 : f32 to vector<16x128xf32>
    %119 = arith.maximumf %117, %118 : vector<16x128xf32>
    %c0_89 = arith.constant 0 : index
    %c0_90 = arith.constant 0 : index
    %120 = vector.load %arg10[%c0_89, %c0_90] : memref<8x16xf32, #tpu.memory_space<vmem>>, vector<8x16xf32>
    %121 = arith.addf %109, %119 : vector<16x128xf32>
    %cst_91 = arith.constant dense<0.000000e+00> : vector<8x128xf32>
    %122 = tpu.matmul %120, %121, %cst_91 {dimension_numbers = #tpu.dot_dimension_numbers<[1], [0], [0], [1], [0, 0, 1, 1], [], []>} : vector<8x16xf32>, vector<16x128xf32>, vector<8x128xf32> -> vector<8x128xf32>
    %c0_92 = arith.constant 0 : index
    %c0_93 = arith.constant 0 : index
    %123 = vector.load %arg11[%c0_92, %c0_93] : memref<8x1xf32, #tpu.memory_space<vmem>>, vector<8x1xf32>
    %124 = vector.broadcast %123 : vector<8x1xf32> to vector<8x128xf32>
    %125 = arith.addf %122, %124 : vector<8x128xf32>
    %c0_94 = arith.constant 0 : index
    %c0_95 = arith.constant 0 : index
    %c0_96 = arith.constant 0 : index
    %126 = vector.load %arg12[%c0_94, %c0_95, %c0_96] : memref<1x8x128xf32, #tpu.memory_space<vmem>>, vector<1x8x128xf32>
    %127 = vector.shape_cast %126 : vector<1x8x128xf32> to vector<8x128xf32>
    %128 = vector.shape_cast %125 : vector<8x128xf32> to vector<1x8x128xf32>
    tpu.vector_store %arg12[%c0_94, %c0_95, %c0_96], %128 {strides = array<i32>} : memref<1x8x128xf32, #tpu.memory_space<vmem>>, vector<1x8x128xf32>,
    return
  }
  func.func @transform_0(%arg0: i32, %arg1: i32) -> (i32, i32, i32) {
    %c0_i32 = arith.constant 0 : i32
    %c0_i32_0 = arith.constant 0 : i32
    return %arg0, %c0_i32, %arg1 : i32, i32, i32
  }
  func.func @transform_1(%arg0: i32, %arg1: i32) -> (i32, i32, i32) {
    %c0_i32 = arith.constant 0 : i32
    %c0_i32_0 = arith.constant 0 : i32
    %c0_i32_1 = arith.constant 0 : i32
    return %arg0, %c0_i32, %c0_i32_0 : i32, i32, i32
  }
  func.func @transform_2(%arg0: i32, %arg1: i32) -> (i32, i32) {
    %c0_i32 = arith.constant 0 : i32
    %c0_i32_0 = arith.constant 0 : i32
    %c0_i32_1 = arith.constant 0 : i32
    return %c0_i32, %c0_i32_0 : i32, i32
  }
  func.func @transform_3(%arg0: i32, %arg1: i32) -> (i32, i32, i32) {
    %c0_i32 = arith.constant 0 : i32
    %c0_i32_0 = arith.constant 0 : i32
    return %arg0, %c0_i32, %arg1 : i32, i32, i32
  }
  func.func @transform_4(%arg0: i32, %arg1: i32) -> (i32, i32, i32) {
    %c0_i32 = arith.constant 0 : i32
    %c0_i32_0 = arith.constant 0 : i32
    %c0_i32_1 = arith.constant 0 : i32
    return %arg0, %c0_i32, %c0_i32_0 : i32, i32, i32
  }
  func.func @transform_5(%arg0: i32, %arg1: i32) -> (i32, i32) {
    %c0_i32 = arith.constant 0 : i32
    %c0_i32_0 = arith.constant 0 : i32
    %c0_i32_1 = arith.constant 0 : i32
    return %c0_i32, %c0_i32_0 : i32, i32
  }
  func.func @transform_6(%arg0: i32, %arg1: i32) -> (i32, i32, i32) {
    %c0_i32 = arith.constant 0 : i32
    %c0_i32_0 = arith.constant 0 : i32
    %c0_i32_1 = arith.constant 0 : i32
    %c0_i32_2 = arith.constant 0 : i32
    return %c0_i32, %c0_i32_0, %c0_i32_1 : i32, i32, i32
  }
  func.func @transform_7(%arg0: i32, %arg1: i32) -> (i32, i32, i32) {
    %c0_i32 = arith.constant 0 : i32
    %c0_i32_0 = arith.constant 0 : i32
    %c0_i32_1 = arith.constant 0 : i32
    %c0_i32_2 = arith.constant 0 : i32
    return %c0_i32, %c0_i32_0, %c0_i32_1 : i32, i32, i32
  }
  func.func @transform_8(%arg0: i32, %arg1: i32) -> (i32, i32) {
    %c0_i32 = arith.constant 0 : i32
    %c0_i32_0 = arith.constant 0 : i32
    %c0_i32_1 = arith.constant 0 : i32
    return %c0_i32, %c0_i32_0 : i32, i32
  }
  func.func @transform_9(%arg0: i32, %arg1: i32) -> (i32, i32) {
    %c0_i32 = arith.constant 0 : i32
    %c0_i32_0 = arith.constant 0 : i32
    %c0_i32_1 = arith.constant 0 : i32
    return %c0_i32, %c0_i32_0 : i32, i32
  }
  func.func @transform_10(%arg0: i32, %arg1: i32) -> (i32, i32, i32) {
    %c0_i32 = arith.constant 0 : i32
    %c0_i32_0 = arith.constant 0 : i32
    return %arg0, %c0_i32, %arg1 : i32, i32, i32
  }
}

</mosaic_0001>

<bundles_post_ra>
// kernel: tpu_custom_call.1
= control target key start
LH: loop header
LB: loop body
LE: loop exit
PB: predicated region body
PF: predicated region fallthrough
CT: control target
= control target key end

     0   :  { %s2943_s0 = inlined_call_operand.vmem [shape: f32[2,8,256], index: 0, kind: input, shape index: {}]   ;;  %s2944_s1 = inlined_call_operand.vmem [shape: f32[2,16,8], index: 1, kind: input, shape index: {}]   ;;  %s2945_s2 = inlined_call_operand.vmem [shape: f32[16,1], index: 2, kind: input, shape index: {}]   ;;  %s2946_s3 = inlined_call_operand.vmem [shape: f32[2,16,256], index: 3, kind: input, shape index: {}]   ;;  %s2947_s4 = inlined_call_operand.hbm [shape: f32[2,16,16], index: 4, kind: input, shape index: {}]   ;;  %s2948_s5 = inlined_call_operand.vmem [shape: f32[16,1], index: 5, kind: input, shape index: {}]   ;;  %s2949_s6 = inlined_call_operand.vmem [shape: f32[10,16,16], index: 6, kind: input, shape index: {}]   ;;  %s2950_s7 = inlined_call_operand.vmem [shape: f32[10,16,1], index: 7, kind: input, shape index: {}]   ;;  %s2951_s8 = inlined_call_operand.vmem [shape: f32[8,16], index: 8, kind: input, shape index: {}]   ;;  %s2952_s9 = inlined_call_operand.vmem [shape: f32[8,1], index: 9, kind: input, shape index: {}]   ;;  %s2953_s10 = inlined_call_operand.hbm [shape: f32[2,8,256], index: 10, kind: output, shape index: {}]  }
   0x1   :  { %2962 = sst [smem:[#allocation16_spill]] %s2943_s0 }
   0x2   :  { %2963 = sst [smem:[#allocation17_spill]] %s2949_s6 }
   0x3   :  { %2964 = sst [smem:[#allocation18_spill]] %s2951_s8 }
   0x4   :  { %2965 = sst [smem:[#allocation19_spill]] %s2952_s9 }
   0x5   :  { %2966 = sst [smem:[#allocation20_spill]] %s2953_s10 }
   0x6   :  { %15 = vsyncpa [#allocation4], 0 }
   0x7   :  { %17 = vsyncpa [#allocation4 + $0x1], 0 }
   0x8   :  { %18 = vsyncpa [#allocation5], 0 }
   0x9   :  { %20 = vsyncpa [#allocation5 + $0x1], 0  ;;  %s2530_s13 = smov 0   ;;  %s2532_s14 = smov 0  }
   0xa   :  { %s2534_s15 = smov 0   ;;  %s2536_s16 = smov 0  }
   0xb   :  { %s2538_s17 = smov 0   ;;  %s2540_s18 = smov 0  }
   0xc   :  { %s2542_s19 = smov 0   ;;  %s2544_s20 = smov 0  }
   0xd   :  { %s2546_s21 = smov 0   ;;  %s2548_s22 = smov 0  }
   0xe   :  { %s2550_s23 = smov 0  }
   0xf LB: > { %2967 = sst [smem:[#allocation9_spill]] %s2425_s13  ;;  %s1938_s24 = sadd.s32 4294967295, %s2465_s23   ;;  %s2465_s23 = sphi %s2550_s23, %s26_s23   ;;  %s2461_s22 = sphi %s2548_s22, %s3004_s22   ;;  %s2457_s21 = sphi %s2546_s21, %s3003_s21   ;;  %s2453_s20 = sphi %s2544_s20, %s3002_s20   ;;  %s2449_s19 = sphi %s2542_s19, %s3001_s19   ;;  %s2445_s18 = sphi %s2540_s18, %s2993_s18   ;;  %s2441_s17 = sphi %s2538_s17, %s3000_s17   ;;  %s2437_s16 = sphi %s2536_s16, %s2999_s16   ;;  %s2433_s15 = sphi %s2534_s15, %s2998_s15   ;;  %s2429_s14 = sphi %s2532_s14, %s2997_s14   ;;  %s2425_s13 = sphi %s2530_s13, %s2996_s13  }
  0x10   : > { %2968 = sst [smem:[#allocation10_spill]] %s2445_s18  ;;  %s1939_s25 = sadd.s32 4294967294, %s2465_s23  }
  0x11   : > { %s35_s26 = sadd.s32 1, %s2457_s21  ;;  %s38_s27 = sadd.s32 1, %s2461_s22 }
  0x12   : > { %p36_p0 = scmp.ge.s32.totalorder %s35_s26, 2  ;;  %s122_s28 = sadd.s32 1, %s2445_s18 }
  0x13   : > { %p129_p1 = scmp.ne.s32.totalorder %s2445_s18, %s2441_s17  ;;  %p130_p2 = scmp.eq.s32.totalorder %s2465_s23, 0 }
  0x14   : > { %s3006_s26 = smov (%p36_p0, %s35_s26), 0  ;;  %s3008_s27 = smov (!%p36_p0, %s38_s27), %s2461_s22 }
  0x15   : > { %2969 = sst [smem:[#allocation11_spill]] %s3006_s26  ;;  %s118_s29 = ssub.s32 %s2457_s21, %s3006_s26 }
  0x16   : > { %p2601_p3 = por %p130_p2, %p129_p1  ;;  %p40_p4 = scmp.ge.s32.totalorder %s3008_s27, 2 }
  0x17   : > { %s148_s11 = sadd.s32 1, %s2437_s16  ;;  %p155_p5 = scmp.ne.s32.totalorder %s2437_s16, %s2433_s15 }
  0x18   : > { %p161_p6 = scmp.ne.s32.totalorder %s2433_s15, %s2429_s14  ;;  %s3010_s27 = smov (%p40_p4, %s3008_s27), 0 }
  0x19   : > { %2971 = sst [smem:[#allocation12_spill]] %s3010_s27  ;;  %p2612_p7 = por %p155_p5, %p130_p2 }
  0x1a   : > { %p162_p8 = scmp.eq.s32.totalorder %s1938_s24, 0  ;;  %s117_s26 = ssub.s32 %s2461_s22, %s3010_s27 }
  0x1b   : > { %p292_p9 = scmp.eq.s32.totalorder %s1938_s24, 3  ;;  %s119_s10 = sor.u32 %s118_s29, %s117_s26 }
  0x1c   : > { %p146_p10 = scmp.eq.s32.totalorder %s117_s26, 0  ;;  %p120_p11 = scmp.eq.s32.totalorder %s119_s10, 0 }
  0x1d   : > { %p2618_p12 = por %p162_p8, %p161_p6  ;;  %p2631_p13 = por %p292_p9, %p129_p1 }
  0x1e   : > { %s2623_s6 = scalar_select %p146_p10, %s2437_s16, %s148_s11  }
  0x1f   : > { %s2626_s14 = scalar_select %p120_p11, %s2445_s18, %s122_s28  }
  0x20   : > { %2974 = sst [smem:[#allocation13_spill]] %s2623_s6  ;;  %p297_p0 = scmp.ne.s32.totalorder %s2441_s17, %s2425_s13 }
  0x21   : > { %2975 = sst [smem:[#allocation14_spill]] %s2626_s14  ;;  %p298_p2 = scmp.eq.s32.totalorder %s1939_s25, 3 }
  0x22   : > { %s2976_s9 = scalar_select %p2631_p13, 1, 0 }
  0x23   : > { %p2637_p4 = por %p298_p2, %p297_p0  ;;  %p1941_p5 = scmp.ge.s32.totalorder %s2465_s23, 4 }
  0x25   : > { %s2977_s24 = scalar_select %p2637_p4, 1, 0 }
  0x26   : > { %332 = sbr.rel (%p1941_p5) target bundleno = 78 (0x4e), region = 40 }
  0x27   : > { %2978 = sst [smem:[#allocation15_spill]] %s2977_s24 }
  0x2d   : > { %354 = sbr.rel (!%p2601_p3) target bundleno = 52 (0x34), region = 52  ;;  %s356_s10 = sand.u32 (%p2601_p3), 1, %s2445_s18  }
  0x2e   : > { %s1943_s26 = sshll.u32 (%p2601_p3), %s2461_s22, 2  ;;  %s1942_s28 = sshll.u32 (%p2601_p3), %s356_s10, 4 }
  0x2f   : > { %s360_s29 = sadd.s32 (%p2601_p3), %s2457_s21, %s1943_s26  ;;  %s358_s6 = scalar_lea.vmem (%p2601_p3), [#allocation2], %s1942_s28 }
  0x30   : > { %s1944_s11 = sshll.u32 (%p2601_p3), %s360_s29, 3 }
  0x31   : > { %s362_s14 = scalar_lea.vmem (%p2601_p3), %s2946_s3, %s1944_s11 }
  0x32   : > { %v392_v0 = vld [vmem:[%s362_s14] sm:$0xff] (%p2601_p3)  ;;  %v394_v1 = vld [vmem:[%s362_s14 + $0x10] sm:$0xff] (%p2601_p3) }
  0x33   : > { %393 = vst [vmem:[%s358_s6] sm:$0xff] (%p2601_p3), %v392_v0  ;;  %395 = vst [vmem:[%s358_s6 + $0x8] sm:$0xff] (%p2601_p3), %v394_v1 }
  0x34 PF: > { %s402_s30 = sand.u32 1, %s2437_s16   ;;  %s2022_s24 = sshll.u32 %s2461_s22, 8 }
  0x35   : > { %s1945_s18 = sshll.u32 %s402_s30, 4  ;;  %s2655_s26 = scalar_lea.hbm %s2947_s4, %s2022_s24 }
  0x36   : > { %s406_s27 = scalar_lea.vmem [#allocation3], %s1945_s18  ;;  %s2659_s6 = scalar_lea.sflag [#allocation4], %s402_s30 }
  0x37   : > { %s413_s14 = sshll.u32 %s406_s27, 4  ;;  %s2315_s28 = scalar_lea.hbm %s2655_s26, 256  ;;  %s2657_s14 = int_to_ptr.vmem [resolvable:$true] %s413_s14 }
  0x38   : > { %p2316_p1 = scmp.ne.s32.totalorder %s2655_s26, %s2315_s28  ;;  %s2319_s13 = scalar_lea.hbm %s2947_s4, 512 }
  0x39   : > { %p2320_p8 = scmp.lt.u32.totalorder %s2655_s26, %s2947_s4  ;;  %p2321_p9 = scmp.lt.u32.totalorder %s2319_s13, %s2315_s28 }
  0x3a   : > { %p2317_p3 = pnand %p2316_p1, %p2612_p7  ;;  %p2323_p11 = scmp.lt.u32.totalorder %s2315_s28, %s2655_s26 }
  0x3b   : > { %p2322_p10 = por %p2321_p9, %p2320_p8 }
  0x3c   : > { %p2318_p6 = pneg %p2317_p3 }
  0x3d   : > { %p2324_p0 = por %p2323_p11, %p2322_p10 }
  0x3f   : > { %p2325_p2 = pnand %p2324_p0, %p2318_p6 }
  0x41   : > { %2328 = shalt.err (!%p2325_p2)
}
  0x42   : > { %s2329_s18 = scalar_lea.vmem %s2657_s14, 256  ;;  %s2467_s30 = smov [#allocation3]  }
  0x43   : > { %p2330_p5 = scmp.ne.s32.totalorder %s2657_s14, %s2329_s18  ;;  %s2333_s10 = sshll.u32 %s2467_s30, 4  ;;  %s2334_s10 = int_to_ptr.vmem [resolvable:$false] %s2333_s10 }
  0x44   : > { %s2335_s27 = scalar_lea.vmem %s2334_s10, 512  ;;  %p2336_p4 = scmp.lt.s32.totalorder %s2657_s14, %s2334_s10 }
  0x45   : > { %p2331_p1 = pnand %p2330_p5, %p2612_p7  ;;  %p2337_p13 = scmp.lt.s32.totalorder %s2335_s27, %s2329_s18 }
  0x47   : > { %p2332_p3 = pneg %p2331_p1  ;;  %p2338_p8 = por %p2337_p13, %p2336_p4 }
  0x49   : > { %p2339_p9 = pnand %p2338_p8, %p2332_p3 }
  0x4b   : > { %2342 = shalt.err (!%p2339_p9)
}
  0x4c   : > { %s2468_s28 = smov 128   ;;  %s2469_s29 = smov 8  }
  0x4d   : > { %2210 = dma.hbm_to_vmem [thread:$0]  (%p2612_p7), %s2655_s26, 256, %s2657_s14, %s2659_s6, %s2468_s28, %s2468_s28, %s2469_s29  }
  0x4e PF: > { %p1948_p6 = scmp.ge.s32.totalorder %s2465_s23, 1  ;;  %p421_p10 = scmp.lt.s32.totalorder %s2465_s23, 5 }
  0x50   : > { %p422_p11 = pnand %p1948_p6, %p421_p10 }
  0x51   : > { %s2686_s11 = sand.u32 (!%p422_p11), 1, %s2441_s17   ;;  %s434_s13 = sand.u32 (!%p422_p11), 1, %s2433_s15  }
  0x52   : > { %425 = sbr.rel (%p422_p11) target bundleno = 1457 (0x5b1), region = 94  ;;  %s1949_s24 = sshll.u32 (!%p422_p11), %s2686_s11, 4 }
  0x53   : > { %s2690_s25 = sshll.u32 (!%p422_p11), %s434_s13, 4  ;;  %s430_s12 = scalar_lea.vmem (!%p422_p11), [#allocation2], %s1949_s24 }
  0x54   : > { %s435_s26 = scalar_lea.sflag (!%p422_p11), [#allocation4], %s434_s13 }
  0x59   : > { %2416 = dma.done.wait (%p2618_p12), %s435_s26, 256  }
  0x5a   : > { %2418 = vsyncadd (%p2618_p12), %s435_s26, 4294967040  ;;  %p492_p7 = scmp.lt.s32.totalorder %s2453_s20, 1  ;;  %p494_p13 = scmp.lt.s32.totalorder %s2449_s19, 1  ;;  %v2470_v2 = vmov 0   ;;  %vm520_vm0 = vcmask 64512   ;;  %vm620_vm1 = vcmask 130048  }
  0x5b   : > { %2313 = vset.pattern.permute.xlu0 %v2470_v2  ;;  %2314 = vset.pattern.permute.xlu1 %v2470_v2  ;;  %s2979_s0 = sld [smem:[#allocation16_spill]]  ;;  %v606_v5 = vld [vmem:[%s430_s12] sm:$0xff]  ;;  %v607_v7 = vld [vmem:[%s430_s12 + $0x8] sm:$0xff]  ;;  %vm2472_vm2 = vmmov 0   ;;  %p2987_p4 = scmp.ne.s32.totalorder %s2976_s9, 0 }
  0x5c   : > { %s493_s6 = scalar_select %p492_p7, %s2453_s20, 1  ;;  %v2163_v9 = vpack.c.bf16 %v607_v7, %v606_v5  ;;  %v508_v10 = vld [vmem:[%s2945_s2] sm:$0xff]  ;;  %v509_v12 = vld [vmem:[%s2945_s2 + $0x8] sm:$0xff]  ;;  %v1964_v17 = vld [vmem:[%s2950_s7 + $0x10] sm:$0xff] }
  0x5d   : > { %s495_s18 = scalar_select %p494_p13, %s2449_s19, 1  ;;  %v608_v11 = vld [vmem:[%s2948_s5] sm:$0xff]  ;;  %512 = vperm.xlu0 %2313, %v508_v10   ;;  %v609_v14 = vld [vmem:[%s2948_s5 + $0x8] sm:$0xff]  ;;  %v1965_v18 = vld [vmem:[%s2950_s7 + $0x18] sm:$0xff] }
  0x5e   : > { %s1952_s30 = sshll.u32 %s493_s6, 1  ;;  %s2023_s10 = sshll.u32 %s493_s6, 4  ;;  %2164 = vmatprep.subr.bf16.mxu1 %v2163_v9  ;;  %612 = vperm.xlu1 %2314, %v608_v11   ;;  %v708_v15 = vld [vmem:[%s2950_s7] sm:$0xff]  ;;  %v709_v16 = vld [vmem:[%s2950_s7 + $0x8] sm:$0xff]  ;;  %v1988_v21 = vld [vmem:[%s2950_s7 + $0x50] sm:$0xff] }
  0x5f   : > { %s497_s27 = sadd.s32 %s1952_s30, %s495_s18  ;;  %s504_s8 = scalar_lea.vmem %s2944_s1, %s2023_s10  ;;  %2166 = vmatpush3.bf16.msra.mxu1 %v2163_v9  ;;  %v1982_v19 = vld [vmem:[%s2950_s7 + $0x40] sm:$0xff]  ;;  %v1983_v20 = vld [vmem:[%s2950_s7 + $0x48] sm:$0xff]  ;;  %v1989_v22 = vld [vmem:[%s2950_s7 + $0x58] sm:$0xff] }
  0x60   : > { %s1953_s13 = sshll.u32 %s497_s27, 3  ;;  %v505_v3 = vld [vmem:[%s504_s8] sm:$0xff]  ;;  %v506_v4 = vld [vmem:[%s504_s8 + $0x8] sm:$0xff]  ;;  %s2980_s6 = scalar_lea.vmem [#allocation3], %s2690_s25  ;;  %v1976_v25 = vld [vmem:[%s2950_s7 + $0x30] sm:$0xff] }
  0x61   : > { %s499_s14 = scalar_lea.vmem %s2979_s0, %s1953_s13  ;;  %2076 = vmatprep.mubr.msk.f32.mxu0 %vm520_vm0, %v505_v3  ;;  %v604_v8 = vld [vmem:[%s2980_s6] sm:$0xff]  ;;  %s2981_s28 = smov %s2980_s6  ;;  %517 = vperm.xlu0 %2313, %v509_v12   ;;  %v1971_v24 = vld [vmem:[%s2950_s7 + $0x28] sm:$0xff]  ;;  %v1977_v26 = vld [vmem:[%s2950_s7 + $0x38] sm:$0xff] }
  0x62   : > { %v507_v6 = vld [vmem:[%s499_s14] sm:$0xff]  ;;  %2083 = vmatprep.mubr.msk.f32.mxu1 %vm620_vm1, %v604_v8  ;;  %v605_v13 = vld [vmem:[%s2981_s28 + $0x8] sm:$0xff]  ;;  %617 = vperm.xlu1 %2314, %v609_v14   ;;  %v2000_v29 = vld [vmem:[%s2950_s7 + $0x70] sm:$0xff]  ;;  %s2982_s13 = sld [smem:[#allocation19_spill]]  ;;  %s2983_s6 = sld [smem:[#allocation17_spill]] }
  0x63   : > { %2074 = vmatprep.subr.mxu0 %v507_v6  ;;  %2084 = vmatmul.mubr.msk.f32.vlgmr.msra.gmra.mrb[0].mxu1 %vm620_vm1, %v605_v13  ;;  %v1970_v23 = vld [vmem:[%s2950_s7 + $0x20] sm:$0xff]  ;;  %v1995_v28 = vld [vmem:[%s2950_s7 + $0x68] sm:$0xff]  ;;  %v2001_v30 = vld [vmem:[%s2950_s7 + $0x78] sm:$0xff]  ;;  %s2984_s18 = sld [smem:[#allocation18_spill]]  ;;  %s1951_s30 = sshll.u32 %s2686_s11, 3 }
  0x64   : > { %2075 = vmatpush3.msra.mxu0 %v507_v6  ;;  %v1994_v27 = vld [vmem:[%s2950_s7 + $0x60] sm:$0xff]  ;;  %v2007_v32 = vld [vmem:[%s2950_s7 + $0x88] sm:$0xff]  ;;  %v2012_v33 = vld [vmem:[%s2950_s7 + $0x90] sm:$0xff]  ;;  %s2018_s10 = sshll.u32 %s2453_s20, 1  ;;  %s491_s14 = scalar_lea.vmem [#allocation6], %s1951_s30 }
  0x65   : > { %2077 = vmatmul.mubr.msk.f32.vlgmr.msra.gmra.mrb[0].mxu0 %vm520_vm0, %v506_v4  ;;  %712 = vperm.xlu0 %2313, %v708_v15   ;;  %v2006_v31 = vld [vmem:[%s2950_s7 + $0x80] sm:$0xff]  ;;  %v2013_v34 = vld [vmem:[%s2950_s7 + $0x98] sm:$0xff]  ;;  %s1801_s27 = sadd.s32 %s2449_s19, %s2018_s10  ;;  %s1805_s28 = sshll.u32 %s491_s14, 4  ;;  %s2882_s28 = int_to_ptr.vmem [resolvable:$true] %s1805_s28 }
  0x66   : > { %717 = vperm.xlu1 %2314, %v709_v16   ;;  %s2019_s12 = sshll.u32 %s1801_s27, 7  ;;  %s1790_s20 = scalar_lea.sflag [#allocation5], %s2686_s11 }
  0x67   : > { %s2343_s19 = scalar_lea.vmem %s2882_s28, 128  ;;  %s2474_s26 = smov [#allocation6]  }
  0x68   : > { %v1709_v35 = vld [vmem:[%s2982_s13] sm:$0xff]  ;;  %v1962_v37 = vld [vmem:[%s2983_s6 + $0x10] sm:$0xff]  ;;  %v705_v60 = vld [vmem:[%s2983_s6 + $0x8] sm:$0xff]  ;;  %s2985_s13 = sld [smem:[#allocation20_spill]]  ;;  %p2344_p12 = scmp.ne.s32.totalorder %s2882_s28, %s2343_s19 }
  0x69   : > { %811 = vperm.xlu0 %2313, %v1964_v17   ;;  %v704_v36 = vld [vmem:[%s2983_s6] sm:$0xff]  ;;  %2097 = vmatprep.mubr.msk.f32.mxu1 %vm620_vm1, %v1962_v37  ;;  %v1963_v61 = vld [vmem:[%s2983_s6 + $0x18] sm:$0xff]  ;;  %v1974_v63 = vld [vmem:[%s2983_s6 + $0x30] sm:$0xff]  ;;  %s2347_s25 = sshll.u32 %s2474_s26, 4  ;;  %s2348_s25 = int_to_ptr.vmem [resolvable:$false] %s2347_s25 }
  0x6a   : > { %816 = vperm.xlu1 %2314, %v1965_v18   ;;  %2090 = vmatprep.mubr.msk.f32.mxu0 %vm620_vm1, %v704_v36  ;;  %v1968_v62 = vld [vmem:[%s2983_s6 + $0x20] sm:$0xff]  ;;  %p2345_p0 = pnand %p2344_p12, %p2987_p4  ;;  %p2350_p5 = scmp.lt.s32.totalorder %s2882_s28, %s2348_s25 }
  0x6c   : > { %p2346_p2 = pneg %p2345_p0 }
  0x6d   : > { %1110 = vperm.xlu0 %2313, %v1982_v19   ;;  %v1969_v19 = vld [vmem:[%s2983_s6 + $0x28] sm:$0xff] }
  0x6e   : > { %1115 = vperm.xlu1 %2314, %v1983_v20   ;;  %v1975_v20 = vld [vmem:[%s2983_s6 + $0x38] sm:$0xff]  ;;  %s2986_s24 = smov %s2985_s13  ;;  %s2880_s0 = scalar_lea.hbm %s2985_s13, %s2019_s12 }
  0x71   : > { %1211 = vperm.xlu0 %2313, %v1988_v21   ;;  %v1980_v21 = vld [vmem:[%s2983_s6 + $0x40] sm:$0xff] }
  0x72   : > { %1216 = vperm.xlu1 %2314, %v1989_v22   ;;  %v1986_v22 = vld [vmem:[%s2983_s6 + $0x50] sm:$0xff] }
  0x75   : > { %912 = vperm.xlu0 %2313, %v1970_v23   ;;  %v1981_v23 = vld [vmem:[%s2983_s6 + $0x48] sm:$0xff] }
  0x76   : > { %917 = vperm.xlu1 %2314, %v1971_v24   ;;  %v1987_v24 = vld [vmem:[%s2983_s6 + $0x58] sm:$0xff] }
  0x79   : > { %1011 = vperm.xlu0 %2313, %v1976_v25   ;;  %v1992_v25 = vld [vmem:[%s2983_s6 + $0x60] sm:$0xff] }
  0x7a   : > { %1016 = vperm.xlu1 %2314, %v1977_v26   ;;  %v1998_v26 = vld [vmem:[%s2983_s6 + $0x70] sm:$0xff] }
  0x7d   : > { %1312 = vperm.xlu0 %2313, %v1994_v27  }
  0x7e   : > { %1317 = vperm.xlu1 %2314, %v1995_v28  }
  0x81   : > { %1413 = vperm.xlu0 %2313, %v2000_v29  }
  0x82   : > { %1418 = vperm.xlu1 %2314, %v2001_v30  }
  0x85   : > { %1514 = vperm.xlu0 %2313, %v2006_v31  }
  0x86   : > { %1519 = vperm.xlu1 %2314, %v2007_v32  }
  0x89   : > { %1615 = vperm.xlu0 %2313, %v2012_v33  }
  0x8a   : > { %1620 = vperm.xlu1 %2314, %v2013_v34  }
  0x8d   : > { %1712 = vperm.xlu0 %2313, %v1709_v35  }
  0xdc   : > { %v513_v38 = vpop.permute.xlu0 %512 }
  0xdd   : > { %v613_v39 = vpop.permute.xlu1 %612 }
  0xe0   : > { %v518_v40 = vpop.permute.xlu0 %517 }
  0xe1   : > { %v618_v46 = vpop.permute.xlu1 %617 }
  0xe4   : > { %v713_v0 = vpop.permute.xlu0 %712 }
  0xe5   : > { %v718_v1 = vpop.permute.xlu1 %717 }
  0xe8   : > { %v812_v2 = vpop.permute.xlu0 %811 }
  0xe9   : > { %v817_v3 = vpop.permute.xlu1 %816 }
  0xec   : > { %v1111_v27 = vpop.permute.xlu0 %1110 }
  0xed   : > { %v1116_v28 = vpop.permute.xlu1 %1115 }
  0xf0   : > { %v1212_v29 = vpop.permute.xlu0 %1211 }
  0xf1   : > { %v1217_v30 = vpop.permute.xlu1 %1216 }
  0xf4   : > { %v913_v31 = vpop.permute.xlu0 %912 }
  0xf5   : > { %v918_v32 = vpop.permute.xlu1 %917 }
  0xf8   : > { %v1012_v33 = vpop.permute.xlu0 %1011 }
  0xf9   : > { %v1017_v34 = vpop.permute.xlu1 %1016 }
 0x136   : > { %v2085_v48 = vpop.f32.mrb[0].mxu1 }
 0x137   : > { %v699_v50 = vadd.f32 %v2085_v48, %v618_v46  ;;  %v693_v51 = vpop.f32.mrb[1].mxu1 }
 0x138   : > { %v2078_v41 = vpop.f32.mrb[0].mxu0  ;;  %v694_v53 = vadd.f32 %v693_v51, %v613_v39 }
 0x139   : > { %v599_v42 = vadd.f32 %v2078_v41, %v518_v40  ;;  %v593_v43 = vpop.f32.mrb[1].mxu0  ;;  %v703_v54 = vmax.f32 %v699_v50, 0.0 }
 0x13a   : > { %v594_v44 = vadd.f32 %v593_v43, %v513_v38  ;;  %v702_v55 = vmax.f32 %v694_v53, 0.0 }
 0x13b   : > { %v603_v45 = vmax.f32 %v599_v42, 0.0 }
 0x13c   : > { %v602_v47 = vmax.f32 %v594_v44, 0.0 }
 0x13d   : > { %v1205_v49 = vadd.f32 %v603_v45, %v603_v45  ;;  %v707_v57 = vadd.f32 %v703_v54, %v603_v45 }
 0x13e   : > { %v1204_v52 = vadd.f32 %v602_v47, %v602_v47  ;;  %v706_v58 = vadd.f32 %v702_v55, %v602_v47 }
 0x140   : > { %v2187_v56 = vpack.c.bf16 %v1205_v49, %v1204_v52  ;;  %v2167_v59 = vpack.c.bf16 %v707_v57, %v706_v58 }
 0x142   : > { %2168 = vmatprep.subr.bf16.mxu0 %v2167_v59  ;;  %2172 = vmatprep.subr.bf16.mxu1 %v2167_v59 }
 0x143   : > { %2170 = vmatpush3.bf16.msra.mxu0 %v2167_v59  ;;  %2174 = vmatpush3.bf16.msra.mxu1 %v2167_v59 }
 0x146   : > { %2091 = vmatmul.mubr.msk.f32.vlgmr.msra.gmra.mrb[2].mxu0 %vm620_vm1, %v705_v60  ;;  %2098 = vmatmul.mubr.msk.f32.vlgmr.msra.gmra.mrb[2].mxu1 %vm620_vm1, %v1963_v61 }
 0x147   : > { %2104 = vmatprep.mubr.msk.f32.mxu0 %vm620_vm1, %v1968_v62  ;;  %2111 = vmatprep.mubr.msk.f32.mxu1 %vm620_vm1, %v1974_v63 }
 0x219   : > { %v2092_v4 = vpop.f32.mrb[2].mxu0  ;;  %v2099_v5 = vpop.f32.mrb[2].mxu1 }
 0x21a   : > { %v798_v6 = vadd.f32 %v2092_v4, %v718_v1  ;;  %v897_v7 = vadd.f32 %v2099_v5, %v817_v3  ;;  %v792_v8 = vpop.f32.mrb[3].mxu0  ;;  %v891_v9 = vpop.f32.mrb[3].mxu1  ;;  %v1993_v4 = vld [vmem:[%s2983_s6 + $0x68] sm:$0xff]  ;;  %v1999_v5 = vld [vmem:[%s2983_s6 + $0x78] sm:$0xff] }
 0x21b   : > { %v793_v10 = vadd.f32 %v792_v8, %v713_v0  ;;  %v892_v11 = vadd.f32 %v891_v9, %v812_v2  ;;  %v2010_v8 = vld [vmem:[%s2983_s6 + $0x90] sm:$0xff]  ;;  %v1313_v9 = vpop.permute.xlu0 %1312 }
 0x21c   : > { %v802_v12 = vmax.f32 %v798_v6, 0.0  ;;  %v901_v13 = vmax.f32 %v897_v7, 0.0  ;;  %v2004_v6 = vld [vmem:[%s2983_s6 + $0x80] sm:$0xff]  ;;  %v2005_v7 = vld [vmem:[%s2983_s6 + $0x88] sm:$0xff] }
 0x21d   : > { %v801_v14 = vmax.f32 %v793_v10, 0.0  ;;  %v900_v15 = vmax.f32 %v892_v11, 0.0  ;;  %v1318_v10 = vpop.permute.xlu1 %1317 }
 0x21e   : > { %v906_v16 = vadd.f32 %v901_v13, %v802_v12 }
 0x21f   : > { %v905_v17 = vadd.f32 %v900_v15, %v801_v14  ;;  %v1414_v11 = vpop.permute.xlu0 %1413 }
 0x221   : > { %v2175_v18 = vpack.c.bf16 %v906_v16, %v905_v17  ;;  %v1419_v12 = vpop.permute.xlu1 %1418 }
 0x223   : > { %2176 = vmatprep.subr.bf16.mxu0 %v2175_v18  ;;  %2180 = vmatprep.subr.bf16.mxu1 %v2175_v18 }
 0x224   : > { %2178 = vmatpush3.bf16.msra.mxu0 %v2175_v18  ;;  %2182 = vmatpush3.bf16.msra.mxu1 %v2175_v18 }
 0x225   : > { %2184 = vmatprep.subr.bf16.mxu0 %v2167_v59  ;;  %2188 = vmatprep.subr.bf16.mxu1 %v2187_v56 }
 0x227   : > { %2105 = vmatmul.mubr.msk.f32.vlgmr.msra.gmra.mrb[4].mxu0 %vm620_vm1, %v1969_v19  ;;  %2112 = vmatmul.mubr.msk.f32.vlgmr.msra.gmra.mrb[4].mxu1 %vm620_vm1, %v1975_v20 }
 0x228   : > { %2186 = vmatpush3.bf16.msra.mxu0 %v2167_v59  ;;  %2190 = vmatpush3.bf16.msra.mxu1 %v2187_v56 }
 0x229   : > { %2118 = vmatprep.mubr.msk.f32.mxu0 %vm620_vm1, %v1980_v21  ;;  %2125 = vmatprep.mubr.msk.f32.mxu1 %vm620_vm1, %v1986_v22 }
 0x22b   : > { %2119 = vmatmul.mubr.msk.f32.vlgmr.msra.gmra.mrb[6].mxu0 %vm620_vm1, %v1981_v23  ;;  %2126 = vmatmul.mubr.msk.f32.vlgmr.msra.gmra.mrb[6].mxu1 %vm620_vm1, %v1987_v24 }
 0x22c   : > { %2132 = vmatprep.mubr.msk.f32.mxu0 %vm620_vm1, %v1992_v25  ;;  %2139 = vmatprep.mubr.msk.f32.mxu1 %vm620_vm1, %v1998_v26 }
 0x2fa   : > { %v2106_v35 = vpop.f32.mrb[4].mxu0  ;;  %v2113_v36 = vpop.f32.mrb[4].mxu1 }
 0x2fb   : > { %v998_v37 = vadd.f32 %v2106_v35, %v918_v32  ;;  %v1097_v38 = vadd.f32 %v2113_v36, %v1017_v34  ;;  %v992_v39 = vpop.f32.mrb[5].mxu0  ;;  %v1091_v40 = vpop.f32.mrb[5].mxu1  ;;  %v2473_v32 = vmov 0.0  }
 0x2fc   : > { %v993_v41 = vadd.f32 %v992_v39, %v913_v31  ;;  %v1092_v42 = vadd.f32 %v1091_v40, %v1012_v33  ;;  %v2471_v31 = vmov 0.0|0.0   ;;  %v1520_v33 = vpop.permute.xlu1 %1519  ;;  %v1515_v34 = vpop.permute.xlu0 %1514 }
 0x2fd   : > { %v1002_v43 = vmax.f32 %v998_v37, 0.0  ;;  %v1101_v44 = vmax.f32 %v1097_v38, 0.0 }
 0x2fe   : > { %v1001_v45 = vmax.f32 %v993_v41, 0.0  ;;  %v1100_v46 = vmax.f32 %v1092_v42, 0.0  ;;  %v2120_v47 = vpop.f32.mrb[6].mxu0  ;;  %v2127_v48 = vpop.f32.mrb[6].mxu1 }
 0x2ff   : > { %v1508_v49 = vadd.f32 %v1101_v44, %v1002_v43  ;;  %v1196_v50 = vadd.f32 %v2120_v47, %v1116_v28  ;;  %v1297_v51 = vadd.f32 %v2127_v48, %v1217_v30  ;;  %v1190_v52 = vpop.f32.mrb[7].mxu0  ;;  %v1291_v53 = vpop.f32.mrb[7].mxu1  ;;  %v2011_v30 = vld [vmem:[%s2983_s6 + $0x98] sm:$0xff] }
 0x300   : > { %v1507_v54 = vadd.f32 %v1100_v46, %v1001_v45  ;;  %v1191_v55 = vadd.f32 %v1190_v52, %v1111_v27  ;;  %v1292_v56 = vadd.f32 %v1291_v53, %v1212_v29  ;;  %v1621_v36 = vpop.permute.xlu1 %1620  ;;  %v1616_v39 = vpop.permute.xlu0 %1615 }
 0x301   : > { %v1200_v57 = vmax.f32 %v1196_v50, 0.0  ;;  %v1301_v58 = vmax.f32 %v1297_v51, 0.0  ;;  %v1706_v50 = vld [vmem:[%s2984_s18] sm:$0xff]  ;;  %s2349_s18 = scalar_lea.vmem %s2348_s25, 256 }
 0x302   : > { %v1199_v59 = vmax.f32 %v1191_v55, 0.0  ;;  %v1300_v60 = vmax.f32 %v1292_v56, 0.0  ;;  %v2199_v61 = vpack.c.bf16 %v1508_v49, %v1507_v54  ;;  %p2351_p1 = scmp.lt.s32.totalorder %s2349_s18, %s2343_s19 }
 0x303   : > { %v1306_v62 = vadd.f32 %v1301_v58, %v1200_v57  ;;  %v1407_v63 = vadd.f32 %v1301_v58, %v1301_v58 }
 0x304   : > { %v1305_v0 = vadd.f32 %v1300_v60, %v1199_v59  ;;  %v1406_v1 = vadd.f32 %v1300_v60, %v1300_v60  ;;  %v1713_v51 = vpop.permute.xlu0 %1712  ;;  %p2352_p3 = por %p2351_p1, %p2350_p5 }
 0x306   : > { %v2191_v2 = vpack.c.bf16 %v1306_v62, %v1305_v0  ;;  %v2195_v3 = vpack.c.bf16 %v1407_v63, %v1406_v1  ;;  %p2353_p8 = pnand %p2352_p3, %p2346_p2 }
 0x308   : > { %2192 = vmatprep.subr.bf16.mxu0 %v2191_v2  ;;  %2196 = vmatprep.subr.bf16.mxu1 %v2195_v3 }
 0x309   : > { %2194 = vmatpush3.bf16.msra.mxu0 %v2191_v2  ;;  %2198 = vmatpush3.bf16.msra.mxu1 %v2195_v3 }
 0x30a   : > { %2200 = vmatprep.subr.bf16.mxu0 %v2199_v61 }
 0x30c   : > { %2133 = vmatmul.mubr.msk.f32.vlgmr.msra.gmra.mrb[8].mxu0 %vm620_vm1, %v1993_v4  ;;  %2140 = vmatmul.mubr.msk.f32.vlgmr.msra.gmra.mrb[8].mxu1 %vm620_vm1, %v1999_v5 }
 0x30d   : > { %2202 = vmatpush3.bf16.msra.mxu0 %v2199_v61  ;;  %2146 = vmatprep.mubr.msk.f32.mxu0 %vm620_vm1, %v2004_v6 }
 0x30e   : > { %2153 = vmatprep.mubr.msk.f32.mxu1 %vm620_vm1, %v2010_v8  ;;  %2207 = vmatprep.subr.bf16.mxu0 %v2471_v31 }
 0x310   : > { %2147 = vmatmul.mubr.msk.f32.vlgmr.msra.gmra.mrb[10].mxu0 %vm620_vm1, %v2005_v7 }
 0x311   : > { %2160 = vmatprep.mubr.msk.f32.mxu0 %vm2472_vm2, %v2473_v32 }
 0x3df   : > { %v2134_v13 = vpop.f32.mrb[8].mxu0  ;;  %v2141_v14 = vpop.f32.mrb[8].mxu1 }
 0x3e0   : > { %v1398_v15 = vadd.f32 %v2134_v13, %v1318_v10  ;;  %v1499_v16 = vadd.f32 %v2141_v14, %v1419_v12  ;;  %v1392_v17 = vpop.f32.mrb[9].mxu0  ;;  %v1493_v18 = vpop.f32.mrb[9].mxu1 }
 0x3e1   : > { %v1393_v19 = vadd.f32 %v1392_v17, %v1313_v9  ;;  %v1494_v20 = vadd.f32 %v1493_v18, %v1414_v11 }
 0x3e2   : > { %v1402_v21 = vmax.f32 %v1398_v15, 0.0  ;;  %v1503_v22 = vmax.f32 %v1499_v16, 0.0 }
 0x3e3   : > { %v1401_v23 = vmax.f32 %v1393_v19, 0.0  ;;  %v1502_v24 = vmax.f32 %v1494_v20, 0.0  ;;  %v2148_v25 = vpop.f32.mrb[10].mxu0 }
 0x3e4   : > { %v1609_v26 = vadd.f32 %v1503_v22, %v1402_v21  ;;  %v1594_v27 = vpop.f32.mrb[11].mxu0  ;;  %v1600_v35 = vadd.f32 %v2148_v25, %v1520_v33 }
 0x3e5   : > { %v1608_v28 = vadd.f32 %v1502_v24, %v1401_v23  ;;  %v1595_v37 = vadd.f32 %v1594_v27, %v1515_v34 }
 0x3e6   : > { %v1604_v43 = vmax.f32 %v1600_v35, 0.0 }
 0x3e7   : > { %v2203_v29 = vpack.c.bf16 %v1609_v26, %v1608_v28  ;;  %v1603_v45 = vmax.f32 %v1595_v37, 0.0 }
 0x3e9   : > { %2204 = vmatprep.subr.bf16.mxu1 %v2203_v29 }
 0x3ea   : > { %2206 = vmatpush3.bf16.msra.mxu1 %v2203_v29 }
 0x3ed   : > { %2154 = vmatmul.mubr.msk.f32.vlgmr.msra.gmra.mrb[10].mxu1 %vm620_vm1, %v2011_v30 }
 0x4c0   : > { %v2155_v38 = vpop.f32.mrb[10].mxu1 }
 0x4c1   : > { %v1701_v40 = vadd.f32 %v2155_v38, %v1621_v36  ;;  %v1695_v41 = vpop.f32.mrb[11].mxu1 }
 0x4c2   : > { %v1696_v42 = vadd.f32 %v1695_v41, %v1616_v39 }
 0x4c3   : > { %v1705_v44 = vmax.f32 %v1701_v40, 0.0 }
 0x4c4   : > { %v1704_v46 = vmax.f32 %v1696_v42, 0.0 }
 0x4c5   : > { %v1708_v47 = vadd.f32 %v1705_v44, %v1604_v43 }
 0x4c6   : > { %v1707_v48 = vadd.f32 %v1704_v46, %v1603_v45 }
 0x4c8   : > { %v2208_v49 = vpack.c.bf16 %v1708_v47, %v1707_v48 }
 0x4ca   : > { %2209 = vmatpush3.bf16.msra.mxu0 %v2208_v49 }
 0x4cd   : > { %2161 = vmatmul.mubr.msk.f32.vlgmr.msra.gmra.mrb[12].mxu0 %vm620_vm1, %v1706_v50 }
 0x5a0   : > { %v1784_v52 = vpop.f32.mrb[12].mxu0 }
 0x5a1   : > { %v1785_v53 = vadd.f32 %v1784_v52, %v1713_v51  ;;  %v2162_v54 = vpop.f32.mrb[13].mxu0 }
 0x5a3   : > { %1788 = vst [vmem:[%s491_s14] sm:$0xff] %v1785_v53 }
 0x5a4   : > { %2356 = shalt.err (!%p2353_p8)
}
 0x5a5   : > { %s2357_s11 = scalar_lea.hbm %s2880_s0, 128  ;;  %s2361_s27 = scalar_lea.hbm %s2986_s24, 512 }
 0x5a6   : > { %p2358_p9 = scmp.ne.s32.totalorder %s2880_s0, %s2357_s11  ;;  %p2362_p11 = scmp.lt.u32.totalorder %s2880_s0, %s2986_s24 }
 0x5a7   : > { %p2363_p7 = scmp.lt.u32.totalorder %s2361_s27, %s2357_s11  ;;  %p2365_p12 = scmp.lt.u32.totalorder %s2357_s11, %s2880_s0 }
 0x5a8   : > { %p2359_p6 = pnand %p2358_p9, %p2987_p4 }
 0x5a9   : > { %p2364_p13 = por %p2363_p7, %p2362_p11 }
 0x5aa   : > { %p2360_p10 = pneg %p2359_p6 }
 0x5ab   : > { %p2366_p0 = por %p2365_p12, %p2364_p13 }
 0x5ad   : > { %p2367_p2 = pnand %p2366_p0, %p2360_p10 }
 0x5af   : > { %2370 = shalt.err (!%p2367_p2)
}
 0x5b0   : > { %2212 = dma.vmem_to_hbm [thread:$0]  (%p2987_p4), %s2882_s28, 128, %s2880_s0, %s1790_s20  }
 0x5b1 PF: > { %s2988_s29 = sld [smem:[#allocation9_spill]]  ;;  %s2989_s8 = sld [smem:[#allocation15_spill]] }
 0x5b2   : > { %p2218_p5 = scmp.ge.s32.totalorder %s2465_s23, 2 }
 0x5b7   : > { %s1817_s13 = sand.u32 1, %s2988_s29   ;;  %p2990_p1 = scmp.ne.s32.totalorder %s2989_s8, 0 }
 0x5b8   : > { %s1818_s19 = scalar_lea.sflag [#allocation5], %s1817_s13 }
 0x5b9   : > { %p2215_p3 = pnand %p2218_p5, %p2990_p1 }
 0x5bb   : > { %2420 = dma.done.wait (!%p2215_p3), %s1818_s19, 128  }
 0x5bc   : > { %2422 = vsyncadd (!%p2215_p3), %s1818_s19, 4294967168  ;;  %s26_s23 = sadd.s32 1, %s2465_s23   ;;  %s2991_s9 = sld [smem:[#allocation13_spill]] }
 0x5bd   : > { %p23_p8 = scmp.ge.s32.totalorder %s26_s23, 6   ;;  %s2992_s26 = sld [smem:[#allocation10_spill]] }
 0x5be   : > { %s2993_s18 = sld [smem:[#allocation14_spill]]  ;;  %s2994_s0 = sld [smem:[#allocation11_spill]] }
 0x5bf   : > { %s2995_s28 = sld [smem:[#allocation12_spill]]  ;;  %s2996_s13 = smov %s2441_s17 }
 0x5c0   : > { %s2997_s14 = smov %s2433_s15  ;;  %s2998_s15 = smov %s2437_s16 }
 0x5c1   : > { %s3001_s19 = smov %s2457_s21  ;;  %s3002_s20 = smov %s2461_s22 }
 0x5c2   : > { %s2999_s16 = smov %s2991_s9  ;;  %25 = sbr.rel (!%p23_p8) target bundleno = 15 (0xf), region = 175 }
 0x5c3   : > { %s3000_s17 = smov %s2992_s26 }
 0x5c4   : > { %s3003_s21 = smov %s2994_s0 }
 0x5c5   : > { %s3004_s22 = smov %s2995_s28 }
 0x5c9   :  { %1823 = vsyncpa [#allocation4], 1 }
 0x5ca   :  { %1825 = vsyncpa [#allocation4 + $0x1], 1 }
 0x5cb   :  { %1826 = vsyncpa [#allocation5], 1 }
 0x5cc   :  { %1828 = vsyncpa [#allocation5 + $0x1], 1 }

</bundles_post_ra>
